<compile_context>
chip_gen: v7x
topology: tpu7x:2x2x1
jax: 0.10.0
libtpu: 0.0.40
codegen_flags: <defaults>
</compile_context>

<pallas_src>
import functools

import jax
import jax.numpy as jnp
from jax import lax
from jax.experimental import pallas as pl
from jax.experimental.pallas import tpu as pltpu


def _round_up(n, m):
    return ((n + m - 1) // m) * m


def _coord_rows(hw_tile, lane_offset, width):
    """(2, hw_tile) f32 coordinate rows: row 0 = u (column), row 1 = v (row)."""
    idx = lax.broadcasted_iota(jnp.int32, (2, hw_tile), 1) + lane_offset
    g = idx.astype(jnp.float32)
    v = jnp.floor((g + 0.5) * (1.0 / width))      # +0.5 guards fp rounding of g/W
    u = g - v * width
    sel = lax.broadcasted_iota(jnp.int32, (2, hw_tile), 0)
    return jnp.where(sel == 0, u, v)


def _softargmax_eval_kernel(x_ref, w_ref, out_ref, heat_ref, *, width, out_pad):
    # x_ref:    (1, C_in, HW)   native dtype, full spatial extent
    # w_ref:    (nv_t, C_in)    1x1 conv weight (x dtype, 1/temp pre-folded)
    # out_ref:  (1, nv_t, OUT_PAD) f32; lanes [0,C_in)=key_feature, [C_in,C_in+2)=(u,v)
    # heat_ref: (1, nv_t, HW)   bf16 softmax heatmap (eval-only debug output)
    x = x_ref[0]                                               # (C_in, HW)
    c_in, hw = x.shape
    nv = w_ref.shape[0]

    # 1x1 conv on the MXU (bias is a no-op for the spatial softmax).
    logits = jnp.dot(w_ref[...], x,
                     preferred_element_type=jnp.float32)       # (nv, HW)

    m = jnp.max(logits, axis=-1, keepdims=True)                # (nv, 1)
    e = jnp.exp(logits - m)                                    # (nv, HW) f32
    denom = jnp.sum(e, axis=-1, keepdims=True)
    inv = pl.reciprocal(denom, approx=True)                    # EUP
    inv = inv * (2.0 - denom * inv)                            # Newton -> f32 accurate

    # Fused feature + coordinate reduction: one MXU pass contracting HW.
    # TODO(synk): for spatial extents > 256 with bf16 inputs keep the coord
    # rows in f32 (separate tiny dot) to preserve exact integer coordinates.
    coords = _coord_rows(hw, 0, width).astype(x.dtype)         # (2, HW)
    rhs = jnp.concatenate([x, coords], axis=0)                 # (C_in+2, HW)
    dn = (((1,), (1,)), ((), ()))                              # A @ B^T over HW
    sums = lax.dot_general(e.astype(x.dtype), rhs, dn,
                           preferred_element_type=jnp.float32)  # (nv, C_in+2)
    pad = out_pad - (c_in + 2)
    if pad:
        sums = jnp.concatenate(
            [sums, jnp.zeros((nv, pad), jnp.float32)], axis=-1)
    out_ref[0] = (sums * inv).astype(out_ref.dtype)            # lane-dense store
    heat_ref[0] = (e * inv).astype(heat_ref.dtype)             # bf16 writeback


def _softargmax_train_kernel(x_ref, w_ref, out_ref, m_ref, l_ref, acc_ref, *,
                             width, hw_valid, out_pad, ragged):
    # HW-tiled online softmax: grid = (B, NVT, KT) with KT "arbitrary".
    # x_ref: (1, C_in, hw_tile); w_ref: (nv_t, C_in); out_ref: (1, nv_t, OUT_PAD)
    # scratch: m_ref/l_ref (nv_t, 1) f32, acc_ref (nv_t, OUT_PAD) f32
    k = pl.program_id(2)
    nk = pl.num_programs(2)

    @pl.when(k == 0)
    def _():
        m_ref[...] = jnp.full(m_ref.shape, -jnp.inf, m_ref.dtype)
        l_ref[...] = jnp.zeros(l_ref.shape, l_ref.dtype)
        acc_ref[...] = jnp.zeros(acc_ref.shape, acc_ref.dtype)

    x = x_ref[0]                                               # (C_in, hw_tile)
    c_in, hw_tile = x.shape
    nv = w_ref.shape[0]

    logits = jnp.dot(w_ref[...], x,
                     preferred_element_type=jnp.float32)       # (nv, hw_tile)

    if ragged:
        # Last tile extends past H*W: mask with a (1, hw_tile) row (cheap) and
        # zero the out-of-bounds x tail so boundary-block garbage cannot leak.
        lane = lax.broadcasted_iota(jnp.int32, (1, hw_tile), 1) + k * hw_tile
        valid = lane < hw_valid
        logits = jnp.where(valid, logits, -1e30)
        x = jnp.where(valid, x, jnp.zeros_like(x))

    m_prev = m_ref[...]
    m_new = jnp.maximum(m_prev, jnp.max(logits, axis=-1, keepdims=True))
    alpha = jnp.exp(m_prev - m_new)                            # (nv, 1)
    e = jnp.exp(logits - m_new)                                # (nv, hw_tile) f32

    coords = _coord_rows(hw_tile, k * hw_tile, width).astype(x.dtype)
    rhs = jnp.concatenate([x, coords], axis=0)                 # (C_in+2, hw_tile)
    dn = (((1,), (1,)), ((), ()))
    part = lax.dot_general(e.astype(x.dtype), rhs, dn,
                           preferred_element_type=jnp.float32)  # (nv, C_in+2)
    pad = out_pad - (c_in + 2)
    if pad:
        part = jnp.concatenate(
            [part, jnp.zeros((nv, pad), jnp.float32)], axis=-1)

    m_ref[...] = m_new
    l_ref[...] = alpha * l_ref[...] + jnp.sum(e, axis=-1, keepdims=True)
    acc_ref[...] = alpha * acc_ref[...] + part

    @pl.when(k == nk - 1)
    def _():
        denom = l_ref[...]
        inv = pl.reciprocal(denom, approx=True)
        inv = inv * (2.0 - denom * inv)
        out_ref[0] = (acc_ref[...] * inv).astype(out_ref.dtype)


def _pick_vmem_limit(est_bytes):
    """Generation-aware scoped-VMEM limit (None keeps the compiler default)."""
    try:
        phys = int(getattr(pltpu.get_tpu_info(), "vmem_capacity_bytes", 64 << 20))
    except Exception:
        phys = 64 << 20                      # conservative (v7x per-core)
    want = est_bytes + (4 << 20)             # headroom for spills / misc
    if want <= (16 << 20):                   # fits v5e's smallest default limit
        return None
    return min(want, max(phys - (2 << 20), 16 << 20))


def softargmax_feature_forward(x, conv_w, conv_b, y=None, *, softmax_temp=1.0,
                               down_scale=4.0, training=False, hw_tile=None,
                               heatmap_dtype=jnp.bfloat16):
    """Forward pass of the PyTorch `softargmax_feature` module.

    x: (B, C_in, H, W) (any float dtype, kept native); conv_w: (num_vec, C_in, 1, 1);
    conv_b: (num_vec,).  y is the (unused) pose argument of the original forward.
    Returns (output_dict, debug_info) mirroring the PyTorch module.
    """
    del y  # unused by the original forward as well
    B, C_in, H, W = x.shape
    num_vec = conv_w.shape[0]
    HW = H * W
    OUT_PAD = _round_up(C_in + 2, 128)
    itemsize = jnp.dtype(x.dtype).itemsize

    # No host-side cast/pad pass over x: reshape is a layout-preserving bitcast.
    x_flat = x.reshape(B, C_in, HW)
    # Fold 1/temp into the conv weight (cast to x dtype -> bf16-in/bf16-in MXU);
    # drop the bias (spatial softmax is shift-invariant per channel).
    w2d = (conv_w.reshape(num_vec, C_in).astype(jnp.float32)
           / softmax_temp).astype(x.dtype)
    del conv_b

    # Megacore: split num_vec over a second "parallel" axis when B == 1 so both
    # v7x TensorCores are busy (restricted to num_vec % 16 == 0 so the nv-tiled
    # blocks keep sublane dims that are multiples of 8).
    nvt = 2 if (B == 1 and num_vec % 16 == 0) else 1
    nv_t = num_vec // nvt

    if not training:
        # Eval path: single HW slab per (b, nv-tile) step; the heatmap needs the
        # global softmax denominator, so HW is not tiled here.
        # TODO(synk): if eval-time H*W ever exceeds VMEM on v7x, switch to a
        # two-pass (stats then normalize) variant instead of raising the limit.
        est = (2 * C_in * HW * itemsize                       # x block (x2 buffers)
               + 2 * nv_t * HW * jnp.dtype(heatmap_dtype).itemsize
               + 2 * nv_t * OUT_PAD * 4
               + (3 * nv_t + C_in + 8) * HW * 4)              # logits/e/coords/rhs
        kernel = functools.partial(_softargmax_eval_kernel,
                                   width=W, out_pad=OUT_PAD)
        merged, heat = pl.pallas_call(
            kernel,
            out_shape=(jax.ShapeDtypeStruct((B, num_vec, OUT_PAD), jnp.float32),
                       jax.ShapeDtypeStruct((B, num_vec, HW), heatmap_dtype)),
            grid_spec=pltpu.PrefetchScalarGridSpec(
                num_scalar_prefetch=0,
                grid=(B, nvt),
                in_specs=[pl.BlockSpec((1, C_in, HW), lambda b, t: (b, 0, 0)),
                          pl.BlockSpec((nv_t, C_in), lambda b, t: (t, 0))],
                out_specs=[pl.BlockSpec((1, nv_t, OUT_PAD),
                                        lambda b, t: (b, t, 0)),
                           pl.BlockSpec((1, nv_t, HW),
                                        lambda b, t: (b, t, 0))]),
            compiler_params=pltpu.CompilerParams(
                dimension_semantics=("parallel", "parallel"),
                vmem_limit_bytes=_pick_vmem_limit(est)),
        )(x_flat, w2d)
    else:
        # Training path: HW tiled with an online softmax (no heatmap writeback).
        if hw_tile is None:
            per_lane = 2 * C_in * itemsize + (2 * nv_t + C_in + 8) * 4
            tgt = max(512, min(HW, (6 << 20) // max(per_lane, 1)))
            hw_tile = max(512, (tgt // 128) * 128)
        if hw_tile >= HW:
            hw_tile, kt, ragged = HW, 1, False      # full extent (may be unaligned)
        else:
            hw_tile = max(128, (hw_tile // 128) * 128)
            kt = pl.cdiv(HW, hw_tile)
            ragged = (kt * hw_tile != HW)
        est = (2 * C_in * hw_tile * itemsize
               + 3 * nv_t * OUT_PAD * 4
               + (2 * nv_t + C_in + 8) * hw_tile * 4)
        kernel = functools.partial(_softargmax_train_kernel, width=W,
                                   hw_valid=HW, out_pad=OUT_PAD, ragged=ragged)
        merged = pl.pallas_call(
            kernel,
            out_shape=jax.ShapeDtypeStruct((B, num_vec, OUT_PAD), jnp.float32),
            grid_spec=pltpu.PrefetchScalarGridSpec(
                num_scalar_prefetch=0,
                grid=(B, nvt, kt),
                in_specs=[pl.BlockSpec((1, C_in, hw_tile),
                                       lambda b, t, k: (b, 0, k)),
                          pl.BlockSpec((nv_t, C_in), lambda b, t, k: (t, 0))],
                out_specs=pl.BlockSpec((1, nv_t, OUT_PAD),
                                       lambda b, t, k: (b, t, 0)),
                scratch_shapes=[pltpu.VMEM((nv_t, 1), jnp.float32),
                                pltpu.VMEM((nv_t, 1), jnp.float32),
                                pltpu.VMEM((nv_t, OUT_PAD), jnp.float32)]),
            compiler_params=pltpu.CompilerParams(
                dimension_semantics=("parallel", "parallel", "arbitrary"),
                vmem_limit_bytes=_pick_vmem_limit(est)),
        )(x_flat, w2d)
        heat = None

    key_feature = merged[..., :C_in]
    uv = merged[..., C_in:C_in + 2]
    u = uv[..., 0:1]
    # NOTE: replicates the original PyTorch get_coords exactly: BOTH normalized
    # entries are built from the u (column) coordinate, divided by H and by W.
    key_coords = jnp.concatenate([u / H * 2.0 - 1.0, u / W * 2.0 - 1.0], axis=-1)

    output_dict = {"key_feature": key_feature, "key_coords": key_coords}
    debug_info = {}
    if not training:
        debug_info["extractor_uv"] = uv * down_scale
        debug_info["extractor_heatmap"] = heat.reshape(B, num_vec, H, W)
    return output_dict, debug_info


def _reference_forward(x, conv_w, conv_b, *, softmax_temp=1.0):
    """Pure-JAX reference mirroring the PyTorch module (bias included)."""
    B, C_in, H, W = x.shape
    num_vec = conv_w.shape[0]
    w = conv_w.reshape(num_vec, C_in)
    logits = jnp.einsum("bchw,kc->bkhw", x, w) + conv_b.reshape(1, num_vec, 1, 1)
    flat = logits.reshape(B, num_vec, H * W) / softmax_temp
    p = jax.nn.softmax(flat, axis=-1)                              # (B, nv, HW)
    key_feature = jnp.einsum("bkn,bcn->bkc", p, x.reshape(B, C_in, H * W))
    idx = jnp.arange(H * W)
    u_grid = (idx % W).astype(jnp.float32)
    v_grid = (idx // W).astype(jnp.float32)
    u = jnp.sum(p * u_grid, axis=-1)
    v = jnp.sum(p * v_grid, axis=-1)
    coords = jnp.stack([u, v], axis=-1)
    norm_coords = jnp.stack([u / H * 2.0 - 1.0, u / W * 2.0 - 1.0], axis=-1)
    smax = p.reshape(B, num_vec, H, W)
    return key_feature, norm_coords, coords, smax


if __name__ == "__main__":
    key = jax.random.PRNGKey(0)
    down_scale = 4.0
    temp = 0.5   # exercises the temperature folding

    def run_case(B, C_in, H, W, num_vec, case_key, *, dtype=jnp.float32,
                 train_hw_tile=None):
        kx, kw, kb, ky = jax.random.split(case_key, 4)
        x_f32 = jax.random.normal(kx, (B, C_in, H, W), dtype=jnp.float32)
        y = jax.random.normal(ky, (B, num_vec, 2), dtype=jnp.float32)  # unused pose
        conv_w = jax.random.normal(kw, (num_vec, C_in, 1, 1), dtype=jnp.float32) * 0.1
        # Large bias: locks in the "softmax is shift-invariant" bias-drop claim.
        conv_b = jax.random.normal(kb, (num_vec,), dtype=jnp.float32) * 2.0

        x = x_f32.astype(dtype)
        feat_ref, nc_ref, coords_ref, smax_ref = _reference_forward(
            x.astype(jnp.float32), conv_w, conv_b, softmax_temp=temp)

        lo = dtype != jnp.float32
        f_tol = dict(atol=5e-2 if lo else 1e-3, rtol=5e-2 if lo else 1e-3)
        c_tol = dict(atol=3e-2 if lo else 1e-3, rtol=1e-2 if lo else 1e-3)
        uv_tol = dict(atol=0.3 if lo else 5e-3, rtol=1e-2 if lo else 1e-3)
        h_tol = dict(atol=2e-2 if lo else 5e-3, rtol=5e-2 if lo else 1e-2)

        # Eval path (single-slab kernel; emits the bf16 heatmap).
        out_e, dbg_e = softargmax_feature_forward(
            x, conv_w, conv_b, y, softmax_temp=temp, down_scale=down_scale,
            training=False)
        jax.block_until_ready(out_e["key_feature"])
        assert out_e["key_feature"].shape == (B, num_vec, C_in)
        assert out_e["key_coords"].shape == (B, num_vec, 2)
        assert dbg_e["extractor_heatmap"].shape == (B, num_vec, H, W)
        assert jnp.allclose(out_e["key_feature"], feat_ref, **f_tol)
        assert jnp.allclose(out_e["key_coords"], nc_ref, **c_tol)
        assert jnp.allclose(dbg_e["extractor_uv"], coords_ref * down_scale, **uv_tol)
        assert jnp.allclose(dbg_e["extractor_heatmap"].astype(jnp.float32),
                            smax_ref, **h_tol)

        # Training path (HW-tiled online-softmax kernel, no heatmap writeback).
        out_t, dbg_t = softargmax_feature_forward(
            x, conv_w, conv_b, y, softmax_temp=temp, down_scale=down_scale,
            training=True, hw_tile=train_hw_tile)
        jax.block_until_ready(out_t["key_feature"])
        assert not dbg_t
        assert jnp.allclose(out_t["key_feature"], feat_ref, **f_tol)
        assert jnp.allclose(out_t["key_coords"], nc_ref, **c_tol)
        # Online-softmax path must agree with the single-slab path.
        assert jnp.allclose(out_t["key_feature"], out_e["key_feature"],
                            atol=2e-2 if lo else 2e-3, rtol=1e-2 if lo else 1e-3)

    ks = jax.random.split(key, 4)
    # Aligned HW (256); training path forced to 2 HW tiles (online softmax).
    run_case(2, 4, 16, 16, 8, ks[0], train_hw_tile=128)
    # Unaligned HW (=120): full-extent lane blocks, no host-side padding.
    run_case(2, 4, 10, 12, 8, ks[1])
    # B == 1: num_vec split over a second parallel axis (megacore) + ragged
    # last HW tile (320 lanes, tile=128 -> 3 tiles, masked tail).
    run_case(1, 4, 16, 20, 16, ks[2], train_hw_tile=128)
    # bf16 activations end-to-end through both MXU matmuls (f32 softmax math).
    run_case(2, 4, 16, 16, 8, ks[3], dtype=jnp.bfloat16, train_hw_tile=128)

    print("KERNEL_OK")
</pallas_src>

<mosaic_0001>
module attributes {stable_mosaic.version = 11 : i64} {
  func.func @_softargmax_eval_kernel(%arg0: i32, %arg1: i32, %arg2: memref<1x4x256xf32, #tpu.memory_space<vmem>>, %arg3: memref<8x4xf32, #tpu.memory_space<vmem>>, %arg4: memref<1x8x128xf32, #tpu.memory_space<vmem>>, %arg5: memref<1x8x256xbf16, #tpu.memory_space<vmem>>) attributes {dimension_semantics = [#tpu.dimension_semantics<parallel>, #tpu.dimension_semantics<parallel>], iteration_bounds = array<i64: 2, 1>, scalar_prefetch = 0 : i64, scratch_operands = 0 : i64, tpu.core_type = #tpu.core_type<tc>, window_params = [{transform_indices = @transform_0, window_bounds = array<i64: 1, 4, 256>}, {transform_indices = @transform_1, window_bounds = array<i64: 8, 4>}, {transform_indices = @transform_2, window_bounds = array<i64: 1, 8, 128>}, {transform_indices = @transform_3, window_bounds = array<i64: 1, 8, 256>}]} {
    %c0 = arith.constant 0 : index
    %c0_0 = arith.constant 0 : index
    %c0_1 = arith.constant 0 : index
    %0 = vector.load %arg2[%c0, %c0_0, %c0_1] : memref<1x4x256xf32, #tpu.memory_space<vmem>>, vector<1x4x256xf32>
    %1 = vector.shape_cast %0 : vector<1x4x256xf32> to vector<4x256xf32>
    %c0_2 = arith.constant 0 : index
    %c0_3 = arith.constant 0 : index
    %2 = vector.load %arg3[%c0_2, %c0_3] : memref<8x4xf32, #tpu.memory_space<vmem>>, vector<8x4xf32>
    %cst = arith.constant dense<0.000000e+00> : vector<8x256xf32>
    %3 = tpu.matmul %2, %1, %cst {dimension_numbers = #tpu.dot_dimension_numbers<[1], [0], [0], [1], [0, 0, 1, 1], [], []>} : vector<8x4xf32>, vector<4x256xf32>, vector<8x256xf32> -> vector<8x256xf32>
    %cst_4 = arith.constant dense<0xFF800000> : vector<8xf32>
    %4 = vector.multi_reduction <maximumf>, %3, %cst_4 [1] : vector<8x256xf32> to vector<8xf32>
    %5 = vector.shape_cast %4 : vector<8xf32> to vector<8x1xf32>
    %6 = vector.broadcast %5 : vector<8x1xf32> to vector<8x256xf32>
    %7 = arith.subf %3, %6 : vector<8x256xf32>
    %8 = math.exp %7 : vector<8x256xf32>
    %cst_5 = arith.constant dense<0.000000e+00> : vector<8xf32>
    %9 = vector.multi_reduction <add>, %8, %cst_5 [1] : vector<8x256xf32> to vector<8xf32>
    %10 = vector.shape_cast %9 : vector<8xf32> to vector<8x1xf32>
    %11 = tpu.reciprocal %10 {approx = true} : vector<8x1xf32> -> vector<8x1xf32>
    %12 = arith.mulf %10, %11 : vector<8x1xf32>
    %cst_6 = arith.constant 2.000000e+00 : f32
    %13 = vector.broadcast %cst_6 : f32 to vector<8x1xf32>
    %14 = arith.subf %13, %12 : vector<8x1xf32>
    %15 = arith.mulf %11, %14 : vector<8x1xf32>
    %16 = tpu.iota {dimensions = array<i32: 1>} : vector<2x256xi32>
    %c0_i32 = arith.constant 0 : i32
    %17 = vector.broadcast %c0_i32 : i32 to vector<2x256xi32>
    %18 = arith.addi %16, %17 : vector<2x256xi32>
    %19 = arith.sitofp %18 : vector<2x256xi32> to vector<2x256xf32>
    %cst_7 = arith.constant 5.000000e-01 : f32
    %20 = vector.broadcast %cst_7 : f32 to vector<2x256xf32>
    %21 = arith.addf %19, %20 : vector<2x256xf32>
    %cst_8 = arith.constant 6.250000e-02 : f32
    %22 = vector.broadcast %cst_8 : f32 to vector<2x256xf32>
    %23 = arith.mulf %21, %22 : vector<2x256xf32>
    %24 = math.floor %23 : vector<2x256xf32>
    %cst_9 = arith.constant 1.600000e+01 : f32
    %25 = vector.broadcast %cst_9 : f32 to vector<2x256xf32>
    %26 = arith.mulf %24, %25 : vector<2x256xf32>
    %27 = arith.subf %19, %26 : vector<2x256xf32>
    %28 = tpu.iota {dimensions = array<i32: 0>} : vector<2x256xi32>
    %c0_i32_10 = arith.constant 0 : i32
    %29 = vector.broadcast %c0_i32_10 : i32 to vector<2x256xi32>
    %30 = arith.cmpi eq, %28, %29 : vector<2x256xi32>
    %31 = arith.select %30, %27, %24 : vector<2x256xi1>, vector<2x256xf32>
    %32 = tpu.concatenate %1, %31 in 0 : vector<4x256xf32>, vector<2x256xf32> -> vector<6x256xf32>
    %cst_11 = arith.constant dense<0.000000e+00> : vector<8x6xf32>
    %33 = tpu.matmul %8, %32, %cst_11 {dimension_numbers = #tpu.dot_dimension_numbers<[1], [1], [0], [0], [0, 0, 1, 0], [], []>} : vector<8x256xf32>, vector<6x256xf32>, vector<8x6xf32> -> vector<8x6xf32>
    %cst_12 = arith.constant 0.000000e+00 : f32
    %34 = vector.broadcast %cst_12 : f32 to vector<8x122xf32>
    %35 = tpu.concatenate %33, %34 in 1 : vector<8x6xf32>, vector<8x122xf32> -> vector<8x128xf32>
    %36 = vector.broadcast %15 : vector<8x1xf32> to vector<8x128xf32>
    %37 = arith.mulf %35, %36 : vector<8x128xf32>
    %c0_13 = arith.constant 0 : index
    %c0_14 = arith.constant 0 : index
    %c0_15 = arith.constant 0 : index
    %38 = vector.load %arg4[%c0_13, %c0_14, %c0_15] : memref<1x8x128xf32, #tpu.memory_space<vmem>>, vector<1x8x128xf32>
    %39 = vector.shape_cast %38 : vector<1x8x128xf32> to vector<8x128xf32>
    %40 = vector.shape_cast %37 : vector<8x128xf32> to vector<1x8x128xf32>
    tpu.vector_store %arg4[%c0_13, %c0_14, %c0_15], %40 {strides = array<i32>} : memref<1x8x128xf32, #tpu.memory_space<vmem>>, vector<1x8x128xf32>,
    %41 = vector.broadcast %15 : vector<8x1xf32> to vector<8x256xf32>
    %42 = arith.mulf %8, %41 : vector<8x256xf32>
    %43 = arith.truncf %42 : vector<8x256xf32> to vector<8x256xbf16>
    %c0_16 = arith.constant 0 : index
    %c0_17 = arith.constant 0 : index
    %c0_18 = arith.constant 0 : index
    %44 = vector.load %arg5[%c0_16, %c0_17, %c0_18] : memref<1x8x256xbf16, #tpu.memory_space<vmem>>, vector<1x8x256xbf16>
    %45 = vector.shape_cast %44 : vector<1x8x256xbf16> to vector<8x256xbf16>
    %46 = vector.shape_cast %43 : vector<8x256xbf16> to vector<1x8x256xbf16>
    tpu.vector_store %arg5[%c0_16, %c0_17, %c0_18], %46 {strides = array<i32>} : memref<1x8x256xbf16, #tpu.memory_space<vmem>>, vector<1x8x256xbf16>,
    return
  }
  func.func @transform_0(%arg0: i32, %arg1: i32) -> (i32, i32, i32) {
    %c0_i32 = arith.constant 0 : i32
    %c0_i32_0 = arith.constant 0 : i32
    %c0_i32_1 = arith.constant 0 : i32
    return %arg0, %c0_i32, %c0_i32_0 : i32, i32, i32
  }
  func.func @transform_1(%arg0: i32, %arg1: i32) -> (i32, i32) {
    %c0_i32 = arith.constant 0 : i32
    %c0_i32_0 = arith.constant 0 : i32
    return %arg1, %c0_i32 : i32, i32
  }
  func.func @transform_2(%arg0: i32, %arg1: i32) -> (i32, i32, i32) {
    %c0_i32 = arith.constant 0 : i32
    %c0_i32_0 = arith.constant 0 : i32
    return %arg0, %arg1, %c0_i32 : i32, i32, i32
  }
  func.func @transform_3(%arg0: i32, %arg1: i32) -> (i32, i32, i32) {
    %c0_i32 = arith.constant 0 : i32
    %c0_i32_0 = arith.constant 0 : i32
    return %arg0, %arg1, %c0_i32 : i32, i32, i32
  }
}

</mosaic_0001>

<bundles_post_ra>
// kernel: tpu_custom_call.1
= control target key start
LH: loop header
LB: loop body
LE: loop exit
PB: predicated region body
PF: predicated region fallthrough
CT: control target
= control target key end

     0   :  { %9 = vsyncpa [#allocation3], 0  ;;  %s1098_s0 = inlined_call_operand.hbm [shape: f32[2,4,256], index: 0, kind: input, shape index: {}]   ;;  %s1099_s1 = inlined_call_operand.vmem [shape: f32[8,4], index: 1, kind: input, shape index: {}]   ;;  %s1100_s2 = inlined_call_operand.hbm [shape: f32[2,8,128], index: 2, kind: output, shape index: {0}]   ;;  %s1101_s3 = inlined_call_operand.hbm [shape: bf16[2,8,256], index: 3, kind: output, shape index: {1}]  }
   0x1   :  { %11 = vsyncpa [#allocation3 + $0x1], 0 }
   0x2   :  { %12 = vsyncpa [#allocation4], 0 }
   0x3   :  { %14 = vsyncpa [#allocation4 + $0x1], 0 }
   0x4   :  { %15 = vsyncpa [#allocation7], 0 }
   0x5   :  { %17 = vsyncpa [#allocation7 + $0x1], 0  ;;  %s881_s12 = smov 0   ;;  %s883_s13 = smov 0  }
   0x6   :  { %s885_s14 = smov 0   ;;  %s887_s15 = smov 0  }
   0x7   :  { %s889_s16 = smov 0   ;;  %s891_s17 = smov 0  }
   0x8 LB: > { %s610_s18 = sadd.s32 4294967295, %s855_s17   ;;  %s611_s19 = sadd.s32 4294967294, %s855_s17   ;;  %s855_s17 = sphi %s891_s17, %s23_s17   ;;  %s851_s16 = sphi %s889_s16, %s1117_s16   ;;  %s847_s15 = sphi %s887_s15, %s1116_s15   ;;  %s843_s14 = sphi %s885_s14, %s1115_s14   ;;  %s839_s13 = sphi %s883_s13, %s1114_s13   ;;  %s835_s12 = sphi %s881_s12, %s1113_s12  }
   0x9   : > { %s35_s20 = sadd.s32 1, %s851_s16  ;;  %s42_s21 = sadd.s32 1, %s843_s14 }
   0xa   : > { %p37_p0 = scmp.ge.s32.totalorder %s35_s20, 2  ;;  %p49_p1 = scmp.ne.s32.totalorder %s843_s14, %s839_s13 }
   0xb   : > { %p50_p2 = scmp.eq.s32.totalorder %s855_s17, 0  ;;  %p55_p3 = scmp.ne.s32.totalorder %s839_s13, %s835_s12 }
   0xc   : > { %s1119_s20 = smov (%p37_p0, %s35_s20), 0  ;;  %p56_p5 = scmp.eq.s32.totalorder %s610_s18, 0 }
   0xd   : > { %p922_p4 = por %p50_p2, %p49_p1  ;;  %s39_s23 = ssub.s32 %s851_s16, %s1119_s20 }
   0xe   : > { %p107_p6 = scmp.eq.s32.totalorder %s610_s18, 1  ;;  %p40_p7 = scmp.eq.s32.totalorder %s39_s23, 0 }
   0xf   : > { %p928_p8 = por %p56_p5, %p55_p3  ;;  %p113_p10 = scmp.eq.s32.totalorder %s611_s19, 1 }
  0x10   : > { %p932_p9 = por %p107_p6, %p49_p1  ;;  %p653_p13 = scmp.lt.s32.totalorder %s855_s17, 2 }
  0x11   : > { %s937_s26 = scalar_select %p40_p7, %s843_s14, %s42_s21  }
  0x12   : > { %s1105_s25 = scalar_select %p932_p9, 1, 0 }
  0x13   : > { %p939_p11 = por %p113_p10, %p55_p3  ;;  %s168_s28 = sand.u32 1, %s843_s14  }
  0x14   : > { %s615_s29 = sshll.u32 %s168_s28, 3  ;;  %s633_s30 = sshll.u32 %s851_s16, 7 }
  0x15   : > { %s1106_s27 = scalar_select %p939_p11, 1, 0 }
  0x16   : > { %s950_s6 = scalar_lea.hbm %s1098_s0, %s633_s30  ;;  %s172_s7 = scalar_lea.vmem [#allocation2], %s615_s29 }
  0x17   : > { %s180_s8 = sshll.u32 %s172_s7, 4  ;;  %p956_p0 = pnand %p653_p13, %p922_p4  ;;  %s952_s8 = int_to_ptr.vmem [resolvable:$true] %s180_s8 }
  0x18   : > { %s169_s10 = scalar_lea.sflag [#allocation3], %s168_s28  ;;  %s711_s11 = scalar_lea.hbm %s950_s6, 128 }
  0x19   : > { %p712_p3 = scmp.ne.s32.totalorder %s950_s6, %s711_s11  ;;  %p713_p5 = pneg %p956_p0 }
  0x1a   : > { %s716_s21 = scalar_lea.hbm %s1098_s0, 256  ;;  %p717_p4 = scmp.lt.u32.totalorder %s950_s6, %s1098_s0 }
  0x1b   : > { %p714_p6 = pnand %p713_p5, %p712_p3  ;;  %p718_p10 = scmp.lt.u32.totalorder %s716_s21, %s711_s11 }
  0x1c   : > { %p720_p12 = scmp.lt.u32.totalorder %s711_s11, %s950_s6 }
  0x1d   : > { %p715_p7 = pneg %p714_p6  ;;  %p719_p13 = por %p718_p10, %p717_p4 }
  0x1f   : > { %p721_p1 = por %p720_p12, %p719_p13 }
  0x21   : > { %p722_p2 = pnand %p721_p1, %p715_p7 }
  0x23   : > { %725 = shalt.err (!%p722_p2)
}
  0x24   : > { %s726_s28 = scalar_lea.vmem %s952_s8, 128  ;;  %s857_s29 = smov [#allocation2]  }
  0x25   : > { %p727_p3 = scmp.ne.s32.totalorder %s952_s8, %s726_s28  ;;  %s731_s30 = sshll.u32 %s857_s29, 4  ;;  %s732_s30 = int_to_ptr.vmem [resolvable:$false] %s731_s30 }
  0x26   : > { %s733_s4 = scalar_lea.vmem %s732_s30, 256  ;;  %p734_p9 = scmp.lt.s32.totalorder %s952_s8, %s732_s30 }
  0x27   : > { %p729_p6 = pnand %p727_p3, %p713_p5  ;;  %p735_p4 = scmp.lt.s32.totalorder %s733_s4, %s726_s28 }
  0x29   : > { %p730_p11 = pneg %p729_p6  ;;  %p736_p10 = por %p735_p4, %p734_p9 }
  0x2b   : > { %p737_p12 = pnand %p736_p10, %p730_p11 }
  0x2d   : > { %740 = shalt.err (!%p737_p12)
}
  0x2e   : > { %645 = dma.hbm_to_vmem [thread:$0]  (!%p956_p0), %s950_s6, 128, %s952_s8, %s169_s10  }
  0x2f   : > { %p1108_p1 = scmp.lt.s32.totalorder %s855_s17, 3  ;;  %p1109_p2 = scmp.ge.s32.totalorder %s855_s17, 1 }
  0x31   : > { %p186_p5 = pnand %p1109_p2, %p1108_p1 }
  0x32   : > { %s992_s5 = sand.u32 (!%p186_p5), 1, %s839_s13  }
  0x33   : > { %189 = sbr.rel (%p186_p5) target bundleno = 667 (0x29b), region = 28  ;;  %s995_s7 = sshll.u32 (!%p186_p5), %s992_s5, 3 }
  0x34   : > { %s192_s11 = scalar_lea.sflag (!%p186_p5), [#allocation3], %s992_s5  ;;  %s195_s9 = scalar_lea.vmem (!%p186_p5), [#allocation2], %s995_s7 }
  0x3a   : > { %822 = dma.done.wait (%p928_p8), %s192_s11, 128  }
  0x3b   : > { %824 = vsyncadd (%p928_p8), %s192_s11, 4294967168  ;;  %v858_v0 = vmov 0.0   ;;  %v231_v1 = vld [vmem:[%s195_s9] sm:$0xff]  ;;  %vm239_vm0 = vcmask 1043456   ;;  %vm235_vm1 = vcmask 31744   ;;  %v331_v7 = vlaneseq  ;;  %s628_s24 = sshll.u32 %s847_s15, 7 }
  0x3c   : > { %308 = vmatprep.mubr.f32.mxu0 %v858_v0  ;;  %v234_v2 = vcombine.high %v231_v1, %v231_v1  ;;  %v232_v3 = vld [vmem:[%s1099_s1] sm:$0xff]  ;;  %s226_s10 = scalar_lea.vmem [#allocation6], %s995_s7  ;;  %s1017_s22 = scalar_lea.hbm %s1101_s3, %s628_s24 }
  0x3d   : > { %v332_v8 = vand.u32 127, %v331_v7  ;;  %v347_v19 = vshrl.u32 %v331_v7, 7  ;;  %s481_s18 = sshll.u32 %s226_s10, 4  ;;  %s451_s23 = scalar_lea.sflag [#allocation7], %s992_s5  ;;  %s1019_s18 = int_to_ptr.vmem [resolvable:$true] %s481_s18 }
  0x3e   : > { %622 = vmatprep.subr.msk.mxu0 %vm239_vm0, %v234_v2  ;;  %s741_s28 = scalar_lea.vmem %s1019_s18, 128  ;;  %p1110_p9 = scmp.ne.s32.totalorder %s1105_s25, 0 }
  0x3f   : > { %623 = vmatpush1.msk.msra.mxu0 %vm239_vm0, %v231_v1  ;;  %v333_v9 = vadd.s32 128, %v332_v8  ;;  %v334_v11 = vcvt.s32.f32 %v332_v8  ;;  %vm348_vm2 = vcmp.eq.s32.totalorder %v347_v19, 0  ;;  %p742_p8 = scmp.ne.s32.totalorder %s1019_s18, %s741_s28  ;;  %s859_s29 = smov [#allocation6]  }
  0x40   : > { %624 = vmatmul.mubr.msk.f32.vlgmr.msra.gmra.mrb[0].mxu0 %vm235_vm1, %v232_v3  ;;  %s745_s30 = sshll.u32 %s859_s29, 4  ;;  %s746_s30 = int_to_ptr.vmem [resolvable:$false] %s745_s30 }
  0x41   : > { %v335_v10 = vcvt.s32.f32 %v333_v9  ;;  %v336_v13 = vadd.f32 0.5, %v334_v11  ;;  %p743_p11 = pnand %p742_p8, %p1110_p9  ;;  %s747_s4 = scalar_lea.vmem %s746_s30, 256 }
  0x42   : > { %p748_p7 = scmp.lt.s32.totalorder %s1019_s18, %s746_s30  ;;  %p749_p13 = scmp.lt.s32.totalorder %s747_s4, %s741_s28 }
  0x43   : > { %v337_v12 = vadd.f32 0.5, %v335_v10  ;;  %v338_v15 = vmul.f32 0.0625, %v336_v13  ;;  %p744_p0 = pneg %p743_p11 }
  0x44   : > { %p750_p3 = por %p749_p13, %p748_p7 }
  0x45   : > { %v339_v14 = vmul.f32 0.0625, %v337_v12  ;;  %v340_v17 = vfloor.f32 %v338_v15 }
  0x46   : > { %p751_p6 = pnand %p750_p3, %p744_p0 }
  0x47   : > { %v341_v16 = vfloor.f32 %v339_v14  ;;  %v342_v20 = vmul.f32 16.0, %v340_v17 }
  0x49   : > { %v343_v18 = vmul.f32 16.0, %v341_v16  ;;  %v344_v22 = vsub.f32 %v334_v11, %v342_v20 }
  0x4b   : > { %v345_v21 = vsub.f32 %v335_v10, %v343_v18  ;;  %v349_v25 = vsel %vm348_vm2, %v344_v22, %v340_v17 }
  0x4c   : > { %v354_v26 = vrot.slane %v349_v25, 4 }
  0x4d   : > { %v350_v23 = vsel %vm348_vm2, %v345_v21, %v341_v16 }
  0x4e   : > { %v355_v24 = vrot.slane %v350_v23, 4  ;;  %v358_v28 = vsel %vm239_vm0, %v231_v1, %v354_v26 }
  0x50   : > { %v359_v27 = vsel %vm239_vm0, %v234_v2, %v355_v24 }
  0x51   : > { %360 = vmatprep.subr.mxu1 %v359_v27 }
  0x52   : > { %361 = vmatpush1.xpose.msra.mxu1 %v358_v28 }
 0x113   : > { %v310_v4 = vpop.f32.mrb[0].mxu0 }
 0x114   : > { %v312_v5 = vpop.f32.mrb[1].mxu0 }
 0x115   : > { %v315_v6 = vmax.f32 %v310_v4, %v312_v5 }
 0x117   : > { %316 = vmax.xlane.f32.xlu0 %v315_v6 }
 0x1a4   : > { %v317_v29 = vpop.xlane.xlu0 %316 }
 0x1a5   : > { %v318_v30 = vsub.f32 %v310_v4, %v317_v29  ;;  %v319_v31 = vsub.f32 %v312_v5, %v317_v29 }
 0x1a7   : > { %v320_v32 = vmul.f32 1.442695, %v318_v30  ;;  %v322_v33 = vmul.f32 1.442695, %v319_v31 }
 0x1a9   : > { %705 = vpow2.f32 %v320_v32 }
 0x1aa   : > { %707 = vpow2.f32 %v322_v33 }
 0x1b3   : > { %v706_v34 = vpop.eup %705 }
 0x1b4   : > { %v708_v35 = vpop.eup %707 }
 0x1b5   : > { %424 = vmatprep.mubr.f32.mxu1 %v708_v35  ;;  %v324_v36 = vadd.f32 %v708_v35, %v706_v34 }
 0x1b6   : > { %425 = vmatmul.mubr.f32.vlgmr.msra.gmra.mrb[0].mxu1 %v706_v34 }
 0x1b7   : > { %325 = vadd.xlane.f32.xlu0 %v324_v36 }
 0x244   : > { %v326_v37 = vpop.xlane.xlu0 %325 }
 0x245   : > { %709 = vrcp.f32 %v326_v37 }
 0x24f   : > { %v710_v38 = vpop.eup %709 }
 0x250   : > { %v328_v39 = vmul.f32 %v710_v38, %v326_v37 }
 0x252   : > { %v329_v40 = vsub.f32 2.0, %v328_v39 }
 0x254   : > { %v330_v41 = vmul.f32 %v710_v38, %v329_v40 }
 0x256   : > { %v434_v42 = vmul.f32 %v706_v34, %v330_v41  ;;  %v435_v43 = vmul.f32 %v708_v35, %v330_v41 }
 0x258   : > { %v634_v44 = vpack.c.bf16 %v435_v43, %v434_v42 }
 0x25a   : > { %444 = vst [vmem:[%s226_s10] sm:$0xff] %v634_v44 }
 0x25b   : > { %754 = shalt.err (!%p751_p6)
}
 0x25c   : > { %s755_s11 = scalar_lea.hbm %s1017_s22, 128  ;;  %s759_s8 = scalar_lea.hbm %s1101_s3, 256 }
 0x25d   : > { %p756_p4 = scmp.ne.s32.totalorder %s1017_s22, %s755_s11  ;;  %p760_p1 = scmp.lt.u32.totalorder %s1017_s22, %s1101_s3 }
 0x25e   : > { %p761_p2 = scmp.lt.u32.totalorder %s759_s8, %s755_s11  ;;  %p763_p8 = scmp.lt.u32.totalorder %s755_s11, %s1017_s22 }
 0x25f   : > { %p757_p10 = pnand %p756_p4, %p1110_p9 }
 0x260   : > { %p762_p5 = por %p761_p2, %p760_p1 }
 0x261   : > { %p758_p12 = pneg %p757_p10 }
 0x262   : > { %p764_p11 = por %p763_p8, %p762_p5 }
 0x264   : > { %p765_p0 = pnand %p764_p11, %p758_p12 }
 0x266   : > { %768 = shalt.err (!%p765_p0)
}
 0x267   : > { %639 = dma.vmem_to_hbm [thread:$0]  (%p1110_p9), %s1019_s18, 128, %s1017_s22, %s451_s23   ;;  %vm430_vm3 = vcmask 48128  }
 0x268   : > { %s219_s21 = scalar_lea.vmem [#allocation5], %s995_s7  ;;  %s1049_s4 = scalar_lea.hbm %s1100_s2, %s628_s24 }
 0x269   : > { %s465_s28 = sshll.u32 %s219_s21, 4  ;;  %s446_s18 = scalar_lea.sflag [#allocation4], %s992_s5  ;;  %s1051_s28 = int_to_ptr.vmem [resolvable:$true] %s465_s28 }
 0x26a   : > { %s769_s22 = scalar_lea.vmem %s1051_s28, 128  ;;  %s860_s7 = smov [#allocation5]  }
 0x26b   : > { %p770_p7 = scmp.ne.s32.totalorder %s1051_s28, %s769_s22  ;;  %s773_s23 = sshll.u32 %s860_s7, 4  ;;  %s774_s23 = int_to_ptr.vmem [resolvable:$false] %s773_s23 }
 0x26c   : > { %s775_s15 = scalar_lea.vmem %s774_s23, 256  ;;  %p776_p6 = scmp.lt.s32.totalorder %s1051_s28, %s774_s23 }
 0x26d   : > { %p771_p13 = pnand %p770_p7, %p1110_p9  ;;  %p777_p4 = scmp.lt.s32.totalorder %s775_s15, %s769_s22 }
 0x26f   : > { %p772_p3 = pneg %p771_p13  ;;  %p778_p10 = por %p777_p4, %p776_p6 }
 0x271   : > { %p779_p12 = pnand %p778_p10, %p772_p3 }
 0x289   : > { %v426_v45 = vpop.f32.mrb[0].mxu1 }
 0x28a   : > { %v431_v46 = vsel %vm430_vm3, %v426_v45, 0.0  ;;  %v428_v47 = vpop.f32.mrb[1].mxu1 }
 0x28b   : > { %v432_v48 = vmul.f32 %v431_v46, %v330_v41 }
 0x28d   : > { %433 = vst [vmem:[%s219_s21] sm:$0xff] %v432_v48 }
 0x28e   : > { %782 = shalt.err (!%p779_p12)
}
 0x28f   : > { %s783_s5 = scalar_lea.hbm %s1049_s4, 128  ;;  %s787_s9 = scalar_lea.hbm %s1100_s2, 256 }
 0x290   : > { %p784_p1 = scmp.ne.s32.totalorder %s1049_s4, %s783_s5  ;;  %p788_p8 = scmp.lt.u32.totalorder %s1049_s4, %s1100_s2 }
 0x291   : > { %p789_p11 = scmp.lt.u32.totalorder %s787_s9, %s783_s5  ;;  %p791_p7 = scmp.lt.u32.totalorder %s783_s5, %s1049_s4 }
 0x292   : > { %p785_p2 = pnand %p784_p1, %p1110_p9 }
 0x293   : > { %p790_p0 = por %p789_p11, %p788_p8 }
 0x294   : > { %p786_p5 = pneg %p785_p2 }
 0x295   : > { %p792_p13 = por %p791_p7, %p790_p0 }
 0x297   : > { %p793_p3 = pnand %p792_p13, %p786_p5 }
 0x299   : > { %796 = shalt.err (!%p793_p3)
}
 0x29a   : > { %638 = dma.vmem_to_hbm [thread:$0]  (%p1110_p9), %s1051_s28, 128, %s1049_s4, %s446_s18  }
 0x29b PF: > { %s493_s10 = sand.u32 1, %s835_s12   ;;  %p1111_p6 = scmp.ne.s32.totalorder %s1106_s27, 0 }
 0x29c   : > { %p1112_p4 = scmp.ge.s32.totalorder %s855_s17, 2  ;;  %s494_s19 = scalar_lea.sflag [#allocation4], %s493_s10 }
 0x29e   : > { %p647_p10 = pnand %p1112_p4, %p1111_p6 }
 0x2a0   : > { %826 = dma.done.wait (!%p647_p10), %s494_s19, 128  }
 0x2a1   : > { %828 = vsyncadd (!%p647_p10), %s494_s19, 4294967168  ;;  %s503_s21 = scalar_lea.sflag [#allocation7], %s493_s10 }
 0x2a2   : > { %830 = dma.done.wait (!%p647_p10), %s503_s21, 128  }
 0x2a3   : > { %832 = vsyncadd (!%p647_p10), %s503_s21, 4294967168  ;;  %s23_s17 = sadd.s32 1, %s855_s17   ;;  %s1113_s12 = smov %s839_s13 }
 0x2a4   : > { %p20_p12 = scmp.ge.s32.totalorder %s23_s17, 4   ;;  %s1114_s13 = smov %s843_s14 }
 0x2a5   : > { %s1115_s14 = smov %s937_s26  ;;  %s1116_s15 = smov %s851_s16 }
 0x2a6   : > { %s1117_s16 = smov %s1119_s20  ;;  %22 = sbr.rel (!%p20_p12) target bundleno = 8 (0x8), region = 93 }
 0x2ad   :  { %508 = vsyncpa [#allocation3], 1 }
 0x2ae   :  { %510 = vsyncpa [#allocation3 + $0x1], 1 }
 0x2af   :  { %511 = vsyncpa [#allocation4], 1 }
 0x2b0   :  { %513 = vsyncpa [#allocation4 + $0x1], 1 }
 0x2b1   :  { %514 = vsyncpa [#allocation7], 1 }
 0x2b2   :  { %516 = vsyncpa [#allocation7 + $0x1], 1 }

</bundles_post_ra>
